<compile_context>
chip_gen: v5e
topology: v5e:2x2
jax: 0.10.0
libtpu: 0.0.40
codegen_flags: <defaults>
</compile_context>

<pallas_src>
import functools

import numpy as np
import jax
import jax.numpy as jnp
from jax.experimental import pallas as pl
from jax.experimental.pallas import tpu as pltpu


# ---------------------------------------------------------------------------
# Parameter init (mirrors PositionalEmbedding.__init__): deterministic table.
# ---------------------------------------------------------------------------
def make_sinusoid_table(max_len: int, hidden_dim: int) -> jnp.ndarray:
    pos = np.arange(max_len, dtype=np.float64)[:, None]       # [L, 1]
    i = np.arange(hidden_dim, dtype=np.float64)[None, :]      # [1, H]
    sinusoid = pos / np.power(10000.0, 2.0 * i / hidden_dim)  # [L, H]
    sinusoid[:, 0::2] = np.sin(sinusoid[:, 0::2])
    sinusoid[:, 1::2] = np.cos(sinusoid[:, 1::2])
    return jnp.asarray(sinusoid, dtype=jnp.float32)           # torch.FloatTensor


# ---------------------------------------------------------------------------
# Kernel: one async DMA, HBM table slab -> HBM output.
#   table_hbm : (max_len, hidden) f32, memory_space=ANY (stays in HBM)
#   out_hbm   : (seq_len, hidden) f32, memory_space=ANY (written by the DMA)
#   copy_sem  : DMA completion semaphore
# seq_len is a static Python int closed over via functools.partial, so the
# .at[pl.ds(0, seq_len)] source view costs nothing at runtime.
# ---------------------------------------------------------------------------
def hbm_slab_copy_kernel(table_hbm, out_hbm, copy_sem, *, seq_len: int):
    cp = pltpu.make_async_copy(
        table_hbm.at[pl.ds(0, seq_len)], out_hbm, copy_sem)
    cp.start()
    cp.wait()


def positional_embedding(x: jnp.ndarray, table: jnp.ndarray) -> jnp.ndarray:
    """x: [batch, seq] int token ids. Returns [seq, hidden] float32.

    Semantics match the PyTorch module: embedding(arange(x.size(-1))) with a
    frozen sinusoid table, i.e. table[:seq_len, :].
    """
    seq_len = x.shape[-1]
    max_len, hidden_dim = table.shape
    # nn.Embedding would raise on out-of-range indices; enforce the same here.
    assert seq_len <= max_len, (
        f"seq_len ({seq_len}) must be <= max_len ({max_len})")

    return pl.pallas_call(
        functools.partial(hbm_slab_copy_kernel, seq_len=seq_len),
        out_shape=jax.ShapeDtypeStruct((seq_len, hidden_dim), table.dtype),
        in_specs=[pl.BlockSpec(memory_space=pl.ANY)],   # table stays in HBM
        out_specs=pl.BlockSpec(memory_space=pl.ANY),    # output written by DMA
        scratch_shapes=[pltpu.SemaphoreType.DMA(())],
    )(table)


# ---------------------------------------------------------------------------
# Demo / self-test
# ---------------------------------------------------------------------------
if __name__ == "__main__":
    batch, seq_len = 2, 8
    max_len, hidden_dim = 64, 32

    key = jax.random.PRNGKey(0)
    # token ids (their values are irrelevant to the forward, just like PyTorch)
    x = jax.random.randint(key, (batch, seq_len), 0, max_len, dtype=jnp.int32)

    table = make_sinusoid_table(max_len, hidden_dim)

    out = jax.block_until_ready(positional_embedding(x, table))

    # Reference: embedding(arange(seq_len)) == first seq_len rows of the table.
    ref = table[:seq_len, :]
    assert out.shape == (seq_len, hidden_dim)
    assert out.dtype == jnp.float32
    np.testing.assert_allclose(np.asarray(out), np.asarray(ref),
                               rtol=1e-6, atol=1e-6)

    print("KERNEL_OK")
</pallas_src>

<mosaic_0001>
module attributes {stable_mosaic.version = 11 : i64} {
  func.func @hbm_slab_copy_kernel(%arg0: memref<64x32xf32, #tpu.memory_space<any>>, %arg1: memref<8x32xf32, #tpu.memory_space<any>>, %arg2: memref<!tpu.dma_semaphore, #tpu.memory_space<semaphore_mem>>) attributes {dimension_semantics = [], scalar_prefetch = 0 : i64, scratch_operands = 1 : i64, tpu.core_type = #tpu.core_type<tc>} {
    %c0_i32 = arith.constant 0 : i32
    %c0_i32_0 = arith.constant 0 : i32
    %0 = tpu.memref_slice %arg0[%c0_i32, %c0_i32_0] : memref<64x32xf32, #tpu.memory_space<any>> -> memref<8x32xf32, #tpu.memory_space<any>>
    tpu.enqueue_dma source(%0 : memref<8x32xf32, #tpu.memory_space<any>>) target(%arg1 : memref<8x32xf32, #tpu.memory_space<any>>) target_semaphore(%arg2 : memref<!tpu.dma_semaphore, #tpu.memory_space<semaphore_mem>>)
    %c0_i32_1 = arith.constant 0 : i32
    %c0_i32_2 = arith.constant 0 : i32
    %1 = tpu.memref_slice %arg0[%c0_i32_1, %c0_i32_2] : memref<64x32xf32, #tpu.memory_space<any>> -> memref<8x32xf32, #tpu.memory_space<any>>
    tpu.wait_dma2 semaphore(%arg2 : memref<!tpu.dma_semaphore, #tpu.memory_space<semaphore_mem>>) src(%1 : memref<8x32xf32, #tpu.memory_space<any>>) dst(%arg1 : memref<8x32xf32, #tpu.memory_space<any>>)
    return
  }
}

</mosaic_0001>

<bundles_post_ra>
// kernel: tpu_custom_call.1
= control target key start
LH: loop header
LB: loop body
LE: loop exit
PB: predicated region body
PF: predicated region fallthrough
CT: control target
= control target key end

     0   :  { %s71_s0 = inlined_call_operand.vmem [shape: f32[64,32], index: 0, kind: input, shape index: {}]   ;;  %s72_s1 = inlined_call_operand.hbm [shape: f32[8,32], index: 1, kind: output, shape index: {}]  }
   0x1   :  { %s13_s8 = sshll.u32 %s71_s0, 4  ;;  %s15_s11 = sshll.u32 %s72_s1, 4  ;;  %s14_s8 = int_to_ptr.vmem [resolvable:$true] %s13_s8  ;;  %s16_s11 = int_to_ptr.hbm [resolvable:$true] %s15_s11 }
   0x2   :  { %18 = dma.vmem_to_hbm [thread:$0]  %s14_s8, 128, %s16_s11, [#allocation2] }
   0x3   :  { %53 = dma.done.wait [#allocation2], 128 }
   0x4   :  { %54 = vsyncadd [#allocation2], 4294967168 }
   0x5   :  { %22 = vsyncmov [#allocation2] }
   0x8   :  { %s23_s12 = vpop.sfrf %22 }
   0x9   :  { %p28_p0 = scmp.ne.s32.totalorder %s23_s12, 0 }
   0xb   :  { %27 = shalt.err (%p28_p0)  }

</bundles_post_ra>
